<compile_context>
chip_gen: v7x
topology: tpu7x:2x2x1
jax: 0.10.0
libtpu: 0.0.40
codegen_flags: <defaults>
</compile_context>

<pallas_src>
import functools

import jax
import jax.numpy as jnp
from jax import lax
from jax.experimental import pallas as pl
from jax.experimental.pallas import tpu as pltpu


def _round_up(x, m):
    return (x + m - 1) // m * m


def _rnn_chunk_kernel(xproj_ref, wht_ref, out_ref, h_ref):
    """One time-chunk of the recurrence for one batch block.

    xproj_ref : (T_CHUNK, B_BLOCK, hid_pad) f32   precomputed x[t] @ W_x^T + b
    wht_ref   : (hid_pad, hid_pad)          f32   W_h^T (constant index_map -> resident)
    out_ref   : (T_CHUNK, B_BLOCK, hid_pad) out   hidden states for this chunk
    h_ref     : (B_BLOCK, hid_pad)          f32   carry scratch across time chunks
    """
    t_chunk = out_ref.shape[0]

    # Zero the carry at the first time chunk of every batch block.
    @pl.when(pl.program_id(1) == 0)
    def _():
        h_ref[...] = jnp.zeros_like(h_ref)

    def step(t, h_prev):
        # Keep the serial chain minimal: feed the weight ref directly to the
        # MXU matmul each step (no long-lived hoisted weight value -> no vreg
        # spills injected into the critical path at larger hid_pad).
        # TODO(synk): weight-stationary matmul_push_rhs/acc_lhs would also drop
        # the per-step RHS push from the chain on v5e/v6e.
        pre = jnp.dot(h_prev, wht_ref[...], preferred_element_type=jnp.float32)
        h_new = jnp.maximum(pre + xproj_ref[t], 0.0)
        # Lane-dense, sublane-full store; cast to the output dtype here so the
        # wrapper never makes a second pass over the hidden tensor just to cast.
        out_ref[t] = h_new.astype(out_ref.dtype)
        return h_new

    # Partial unroll: full unroll for short chunks, bounded (8) otherwise.
    unroll = t_chunk if t_chunk <= 8 else 8
    h_last = lax.fori_loop(0, t_chunk, step, h_ref[...], unroll=unroll)
    h_ref[...] = h_last


@functools.partial(jax.jit, static_argnums=(3,))
def simple_rnn_forward(inputs, weight, bias, hid_size):
    """Pallas implementation of SimpleRNNModel.forward.

    inputs : (seq_len, batch, input_size)
    weight : (hid_size, hid_size + input_size)   (torch Linear layout, concat=(hidden, x))
    bias   : (hid_size,)
    Returns (hidden, (hidden[-1][None], None)) like the PyTorch module.
    """
    seq_len, batch, input_size = inputs.shape
    out_dtype = inputs.dtype

    # torch concat order is (hidden, inputs) -> split the Linear weight.
    w_h = weight[:, :hid_size]            # (hid, hid)
    w_x = weight[:, hid_size:]            # (hid, input)

    # Lane padding of hidden (128) and sublane padding of batch (8).
    hid_pad = max(128, _round_up(hid_size, 128))
    # TODO(synk): on v6e/v7x align hid_pad to 256 when hid_size > 128 (2x256x256 MXU).
    batch_pad = max(8, _round_up(batch, 8))
    b_block = batch_pad if batch_pad <= 128 else 128
    batch_pad = _round_up(batch_pad, b_block)

    # Size the time chunk so double-buffered (x_proj chunk + out chunk) plus the
    # resident W_h^T stays well under the 32 MiB scoped-VMEM limit (v7x-safe).
    itemsize_out = jnp.dtype(out_dtype).itemsize
    wht_bytes = hid_pad * hid_pad * 4
    budget = 16 << 20
    per_step = 2 * b_block * hid_pad * (4 + itemsize_out)
    t_chunk = int(min(seq_len, max(1, (budget - 2 * wht_bytes) // per_step), 256))
    seq_pad = _round_up(seq_len, t_chunk)

    # ---- Hoisted, time-independent input projection (off the serial path) ----
    # x_proj[t] = x[t] @ W_x^T + b, for all time steps at once, directly in the
    # padded layout. Padded hidden lanes are exactly zero; padded batch/time
    # rows are inert (independent rows, results discarded by the final slice).
    w_x_t = (
        jnp.zeros((input_size, hid_pad), jnp.float32)
        .at[:, :hid_size]
        .set(jnp.transpose(w_x).astype(jnp.float32))
    )
    b_pad = jnp.zeros((hid_pad,), jnp.float32).at[:hid_size].set(bias.astype(jnp.float32))
    x_pad = jnp.zeros((seq_pad, batch_pad, input_size), jnp.float32)
    x_pad = x_pad.at[:seq_len, :batch].set(inputs.astype(jnp.float32))
    x_proj = (
        x_pad.reshape(seq_pad * batch_pad, input_size) @ w_x_t + b_pad
    ).reshape(seq_pad, batch_pad, hid_pad)
    # TODO(synk): for large shapes fuse this projection into the kernel (per-chunk
    # matmul on idle MXU slots) to skip the HBM round trip of x_proj.

    # W_h^T zero-padded: padded hidden lanes never receive non-zero contributions.
    w_h_t = (
        jnp.zeros((hid_pad, hid_pad), jnp.float32)
        .at[:hid_size, :hid_size]
        .set(jnp.transpose(w_h).astype(jnp.float32))
    )

    grid = (batch_pad // b_block, seq_pad // t_chunk)

    # Explicit VMEM limit sized to the actual footprint (double-buffered chunks
    # + resident W_h^T + carry scratch), capped at the v7x scoped limit.
    chunk_in_bytes = t_chunk * b_block * hid_pad * 4
    chunk_out_bytes = t_chunk * b_block * hid_pad * itemsize_out
    scratch_bytes = b_block * hid_pad * 4
    footprint = 2 * (chunk_in_bytes + chunk_out_bytes) + 2 * wht_bytes + scratch_bytes
    vmem_limit = int(min(max(2 * footprint, 4 << 20), 32 << 20))

    hidden_pad = pl.pallas_call(
        _rnn_chunk_kernel,
        out_shape=jax.ShapeDtypeStruct((seq_pad, batch_pad, hid_pad), out_dtype),
        grid_spec=pltpu.PrefetchScalarGridSpec(
            num_scalar_prefetch=0,
            grid=grid,
            in_specs=[
                pl.BlockSpec((t_chunk, b_block, hid_pad), lambda b, t: (t, b, 0)),
                pl.BlockSpec((hid_pad, hid_pad), lambda b, t: (0, 0)),
            ],
            out_specs=pl.BlockSpec((t_chunk, b_block, hid_pad), lambda b, t: (t, b, 0)),
            scratch_shapes=[pltpu.VMEM((b_block, hid_pad), jnp.float32)],
        ),
        compiler_params=pltpu.CompilerParams(
            dimension_semantics=("parallel", "arbitrary"),
            vmem_limit_bytes=vmem_limit,
        ),
    )(x_proj, w_h_t)

    if (seq_pad, batch_pad, hid_pad) == (seq_len, batch, hid_size):
        hidden = hidden_pad
    else:
        hidden = hidden_pad[:seq_len, :batch, :hid_size]
    return hidden, (hidden[-1][None], None)


def _reference_forward(inputs, weight, bias, hid_size):
    """Pure-JAX reference mirroring the PyTorch loop."""

    def step(h_prev, x_t):
        layer_in = jnp.concatenate([h_prev, x_t], axis=1)
        h = jnp.maximum(layer_in @ weight.T + bias, 0.0)
        return h, h

    h0 = jnp.zeros((inputs.shape[1], hid_size), dtype=inputs.dtype)
    _, hidden = jax.lax.scan(step, h0, inputs)
    return hidden


if __name__ == "__main__":
    seq_len, batch, input_size, hid_size = 8, 4, 16, 32

    key = jax.random.PRNGKey(0)
    k_x, k_w, k_b = jax.random.split(key, 3)

    inputs = jax.random.normal(k_x, (seq_len, batch, input_size), dtype=jnp.float32)
    # Deterministic "torch.nn.Linear(input_size + hid_size, hid_size)" params.
    fan_in = input_size + hid_size
    bound = 1.0 / (fan_in ** 0.5)
    weight = jax.random.uniform(
        k_w, (hid_size, fan_in), minval=-bound, maxval=bound, dtype=jnp.float32
    )
    bias = jax.random.uniform(
        k_b, (hid_size,), minval=-bound, maxval=bound, dtype=jnp.float32
    )

    hidden, (h_last, _) = jax.block_until_ready(
        simple_rnn_forward(inputs, weight, bias, hid_size)
    )

    ref = _reference_forward(inputs, weight, bias, hid_size)
    assert hidden.shape == (seq_len, batch, hid_size)
    assert h_last.shape == (1, batch, hid_size)
    assert jnp.allclose(hidden, ref, atol=1e-5, rtol=1e-5)
    assert jnp.allclose(h_last[0], ref[-1], atol=1e-5, rtol=1e-5)

    print("KERNEL_OK")
</pallas_src>

<mosaic_0001>
module attributes {stable_mosaic.version = 11 : i64} {
  func.func @_rnn_chunk_kernel(%arg0: i32, %arg1: i32, %arg2: memref<8x8x128xf32, #tpu.memory_space<vmem>>, %arg3: memref<128x128xf32, #tpu.memory_space<vmem>>, %arg4: memref<8x8x128xf32, #tpu.memory_space<vmem>>, %arg5: memref<8x128xf32, #tpu.memory_space<vmem>>) attributes {dimension_semantics = [#tpu.dimension_semantics<parallel>, #tpu.dimension_semantics<arbitrary>], iteration_bounds = array<i64: 1, 1>, scalar_prefetch = 0 : i64, scratch_operands = 1 : i64, tpu.core_type = #tpu.core_type<tc>, window_params = [{transform_indices = @transform_0, window_bounds = array<i64: 8, 8, 128>}, {pipeline_mode = #tpu.pipeline_mode<synchronous>, transform_indices = @transform_1, window_bounds = array<i64: 128, 128>}, {transform_indices = @transform_2, window_bounds = array<i64: 8, 8, 128>}]} {
    %c0_i32 = arith.constant 0 : i32
    %0 = arith.cmpi eq, %arg1, %c0_i32 : i32
    %1 = arith.extui %0 : i1 to i32
    %c0_i32_0 = arith.constant 0 : i32
    %2 = arith.cmpi ne, %1, %c0_i32_0 : i32
    scf.if %2 {
      %cst_68 = arith.constant 0.000000e+00 : f32
      %101 = vector.broadcast %cst_68 : f32 to vector<8x128xf32>
      %c0_69 = arith.constant 0 : index
      %c0_70 = arith.constant 0 : index
      %102 = vector.load %arg5[%c0_69, %c0_70] : memref<8x128xf32, #tpu.memory_space<vmem>>, vector<8x128xf32>
      tpu.vector_store %arg5[%c0_69, %c0_70], %101 {strides = array<i32>} : memref<8x128xf32, #tpu.memory_space<vmem>>, vector<8x128xf32>,
    } else {
    }
    %c0 = arith.constant 0 : index
    %c0_1 = arith.constant 0 : index
    %3 = vector.load %arg5[%c0, %c0_1] : memref<8x128xf32, #tpu.memory_space<vmem>>, vector<8x128xf32>
    %c0_i32_2 = arith.constant 0 : i32
    %c0_3 = arith.constant 0 : index
    %c0_4 = arith.constant 0 : index
    %4 = vector.load %arg3[%c0_3, %c0_4] : memref<128x128xf32, #tpu.memory_space<vmem>>, vector<128x128xf32>
    %cst = arith.constant dense<0.000000e+00> : vector<8x128xf32>
    %5 = tpu.matmul %3, %4, %cst {dimension_numbers = #tpu.dot_dimension_numbers<[1], [0], [0], [1], [0, 0, 1, 1], [], []>} : vector<8x128xf32>, vector<128x128xf32>, vector<8x128xf32> -> vector<8x128xf32>
    %6 = arith.index_cast %c0_i32_2 : i32 to index
    %c0_5 = arith.constant 0 : index
    %c0_6 = arith.constant 0 : index
    %7 = vector.load %arg2[%6, %c0_5, %c0_6] : memref<8x8x128xf32, #tpu.memory_space<vmem>>, vector<1x8x128xf32>
    %8 = vector.shape_cast %7 : vector<1x8x128xf32> to vector<8x128xf32>
    %9 = arith.addf %5, %8 : vector<8x128xf32>
    %cst_7 = arith.constant 0.000000e+00 : f32
    %10 = vector.broadcast %cst_7 : f32 to vector<8x128xf32>
    %11 = arith.maximumf %9, %10 : vector<8x128xf32>
    %12 = arith.index_cast %c0_i32_2 : i32 to index
    %c0_8 = arith.constant 0 : index
    %c0_9 = arith.constant 0 : index
    %13 = vector.load %arg4[%12, %c0_8, %c0_9] : memref<8x8x128xf32, #tpu.memory_space<vmem>>, vector<1x8x128xf32>
    %14 = vector.shape_cast %13 : vector<1x8x128xf32> to vector<8x128xf32>
    %15 = vector.shape_cast %11 : vector<8x128xf32> to vector<1x8x128xf32>
    tpu.vector_store %arg4[%12, %c0_8, %c0_9], %15 {strides = array<i32>} : memref<8x8x128xf32, #tpu.memory_space<vmem>>, vector<1x8x128xf32>,
    %c1_i32 = arith.constant 1 : i32
    %c0_10 = arith.constant 0 : index
    %c0_11 = arith.constant 0 : index
    %16 = vector.load %arg3[%c0_10, %c0_11] : memref<128x128xf32, #tpu.memory_space<vmem>>, vector<128x128xf32>
    %cst_12 = arith.constant dense<0.000000e+00> : vector<8x128xf32>
    %17 = tpu.matmul %11, %16, %cst_12 {dimension_numbers = #tpu.dot_dimension_numbers<[1], [0], [0], [1], [0, 0, 1, 1], [], []>} : vector<8x128xf32>, vector<128x128xf32>, vector<8x128xf32> -> vector<8x128xf32>
    %18 = arith.index_cast %c1_i32 : i32 to index
    %c0_13 = arith.constant 0 : index
    %c0_14 = arith.constant 0 : index
    %19 = vector.load %arg2[%18, %c0_13, %c0_14] : memref<8x8x128xf32, #tpu.memory_space<vmem>>, vector<1x8x128xf32>
    %20 = vector.shape_cast %19 : vector<1x8x128xf32> to vector<8x128xf32>
    %21 = arith.addf %17, %20 : vector<8x128xf32>
    %cst_15 = arith.constant 0.000000e+00 : f32
    %22 = vector.broadcast %cst_15 : f32 to vector<8x128xf32>
    %23 = arith.maximumf %21, %22 : vector<8x128xf32>
    %24 = arith.index_cast %c1_i32 : i32 to index
    %c0_16 = arith.constant 0 : index
    %c0_17 = arith.constant 0 : index
    %25 = vector.load %arg4[%24, %c0_16, %c0_17] : memref<8x8x128xf32, #tpu.memory_space<vmem>>, vector<1x8x128xf32>
    %26 = vector.shape_cast %25 : vector<1x8x128xf32> to vector<8x128xf32>
    %27 = vector.shape_cast %23 : vector<8x128xf32> to vector<1x8x128xf32>
    tpu.vector_store %arg4[%24, %c0_16, %c0_17], %27 {strides = array<i32>} : memref<8x8x128xf32, #tpu.memory_space<vmem>>, vector<1x8x128xf32>,
    %c2_i32 = arith.constant 2 : i32
    %c0_18 = arith.constant 0 : index
    %c0_19 = arith.constant 0 : index
    %28 = vector.load %arg3[%c0_18, %c0_19] : memref<128x128xf32, #tpu.memory_space<vmem>>, vector<128x128xf32>
    %cst_20 = arith.constant dense<0.000000e+00> : vector<8x128xf32>
    %29 = tpu.matmul %23, %28, %cst_20 {dimension_numbers = #tpu.dot_dimension_numbers<[1], [0], [0], [1], [0, 0, 1, 1], [], []>} : vector<8x128xf32>, vector<128x128xf32>, vector<8x128xf32> -> vector<8x128xf32>
    %30 = arith.index_cast %c2_i32 : i32 to index
    %c0_21 = arith.constant 0 : index
    %c0_22 = arith.constant 0 : index
    %31 = vector.load %arg2[%30, %c0_21, %c0_22] : memref<8x8x128xf32, #tpu.memory_space<vmem>>, vector<1x8x128xf32>
    %32 = vector.shape_cast %31 : vector<1x8x128xf32> to vector<8x128xf32>
    %33 = arith.addf %29, %32 : vector<8x128xf32>
    %cst_23 = arith.constant 0.000000e+00 : f32
    %34 = vector.broadcast %cst_23 : f32 to vector<8x128xf32>
    %35 = arith.maximumf %33, %34 : vector<8x128xf32>
    %36 = arith.index_cast %c2_i32 : i32 to index
    %c0_24 = arith.constant 0 : index
    %c0_25 = arith.constant 0 : index
    %37 = vector.load %arg4[%36, %c0_24, %c0_25] : memref<8x8x128xf32, #tpu.memory_space<vmem>>, vector<1x8x128xf32>
    %38 = vector.shape_cast %37 : vector<1x8x128xf32> to vector<8x128xf32>
    %39 = vector.shape_cast %35 : vector<8x128xf32> to vector<1x8x128xf32>
    tpu.vector_store %arg4[%36, %c0_24, %c0_25], %39 {strides = array<i32>} : memref<8x8x128xf32, #tpu.memory_space<vmem>>, vector<1x8x128xf32>,
    %c3_i32 = arith.constant 3 : i32
    %c0_26 = arith.constant 0 : index
    %c0_27 = arith.constant 0 : index
    %40 = vector.load %arg3[%c0_26, %c0_27] : memref<128x128xf32, #tpu.memory_space<vmem>>, vector<128x128xf32>
    %cst_28 = arith.constant dense<0.000000e+00> : vector<8x128xf32>
    %41 = tpu.matmul %35, %40, %cst_28 {dimension_numbers = #tpu.dot_dimension_numbers<[1], [0], [0], [1], [0, 0, 1, 1], [], []>} : vector<8x128xf32>, vector<128x128xf32>, vector<8x128xf32> -> vector<8x128xf32>
    %42 = arith.index_cast %c3_i32 : i32 to index
    %c0_29 = arith.constant 0 : index
    %c0_30 = arith.constant 0 : index
    %43 = vector.load %arg2[%42, %c0_29, %c0_30] : memref<8x8x128xf32, #tpu.memory_space<vmem>>, vector<1x8x128xf32>
    %44 = vector.shape_cast %43 : vector<1x8x128xf32> to vector<8x128xf32>
    %45 = arith.addf %41, %44 : vector<8x128xf32>
    %cst_31 = arith.constant 0.000000e+00 : f32
    %46 = vector.broadcast %cst_31 : f32 to vector<8x128xf32>
    %47 = arith.maximumf %45, %46 : vector<8x128xf32>
    %48 = arith.index_cast %c3_i32 : i32 to index
    %c0_32 = arith.constant 0 : index
    %c0_33 = arith.constant 0 : index
    %49 = vector.load %arg4[%48, %c0_32, %c0_33] : memref<8x8x128xf32, #tpu.memory_space<vmem>>, vector<1x8x128xf32>
    %50 = vector.shape_cast %49 : vector<1x8x128xf32> to vector<8x128xf32>
    %51 = vector.shape_cast %47 : vector<8x128xf32> to vector<1x8x128xf32>
    tpu.vector_store %arg4[%48, %c0_32, %c0_33], %51 {strides = array<i32>} : memref<8x8x128xf32, #tpu.memory_space<vmem>>, vector<1x8x128xf32>,
    %c4_i32 = arith.constant 4 : i32
    %c0_34 = arith.constant 0 : index
    %c0_35 = arith.constant 0 : index
    %52 = vector.load %arg3[%c0_34, %c0_35] : memref<128x128xf32, #tpu.memory_space<vmem>>, vector<128x128xf32>
    %cst_36 = arith.constant dense<0.000000e+00> : vector<8x128xf32>
    %53 = tpu.matmul %47, %52, %cst_36 {dimension_numbers = #tpu.dot_dimension_numbers<[1], [0], [0], [1], [0, 0, 1, 1], [], []>} : vector<8x128xf32>, vector<128x128xf32>, vector<8x128xf32> -> vector<8x128xf32>
    %54 = arith.index_cast %c4_i32 : i32 to index
    %c0_37 = arith.constant 0 : index
    %c0_38 = arith.constant 0 : index
    %55 = vector.load %arg2[%54, %c0_37, %c0_38] : memref<8x8x128xf32, #tpu.memory_space<vmem>>, vector<1x8x128xf32>
    %56 = vector.shape_cast %55 : vector<1x8x128xf32> to vector<8x128xf32>
    %57 = arith.addf %53, %56 : vector<8x128xf32>
    %cst_39 = arith.constant 0.000000e+00 : f32
    %58 = vector.broadcast %cst_39 : f32 to vector<8x128xf32>
    %59 = arith.maximumf %57, %58 : vector<8x128xf32>
    %60 = arith.index_cast %c4_i32 : i32 to index
    %c0_40 = arith.constant 0 : index
    %c0_41 = arith.constant 0 : index
    %61 = vector.load %arg4[%60, %c0_40, %c0_41] : memref<8x8x128xf32, #tpu.memory_space<vmem>>, vector<1x8x128xf32>
    %62 = vector.shape_cast %61 : vector<1x8x128xf32> to vector<8x128xf32>
    %63 = vector.shape_cast %59 : vector<8x128xf32> to vector<1x8x128xf32>
    tpu.vector_store %arg4[%60, %c0_40, %c0_41], %63 {strides = array<i32>} : memref<8x8x128xf32, #tpu.memory_space<vmem>>, vector<1x8x128xf32>,
    %c5_i32 = arith.constant 5 : i32
    %c0_42 = arith.constant 0 : index
    %c0_43 = arith.constant 0 : index
    %64 = vector.load %arg3[%c0_42, %c0_43] : memref<128x128xf32, #tpu.memory_space<vmem>>, vector<128x128xf32>
    %cst_44 = arith.constant dense<0.000000e+00> : vector<8x128xf32>
    %65 = tpu.matmul %59, %64, %cst_44 {dimension_numbers = #tpu.dot_dimension_numbers<[1], [0], [0], [1], [0, 0, 1, 1], [], []>} : vector<8x128xf32>, vector<128x128xf32>, vector<8x128xf32> -> vector<8x128xf32>
    %66 = arith.index_cast %c5_i32 : i32 to index
    %c0_45 = arith.constant 0 : index
    %c0_46 = arith.constant 0 : index
    %67 = vector.load %arg2[%66, %c0_45, %c0_46] : memref<8x8x128xf32, #tpu.memory_space<vmem>>, vector<1x8x128xf32>
    %68 = vector.shape_cast %67 : vector<1x8x128xf32> to vector<8x128xf32>
    %69 = arith.addf %65, %68 : vector<8x128xf32>
    %cst_47 = arith.constant 0.000000e+00 : f32
    %70 = vector.broadcast %cst_47 : f32 to vector<8x128xf32>
    %71 = arith.maximumf %69, %70 : vector<8x128xf32>
    %72 = arith.index_cast %c5_i32 : i32 to index
    %c0_48 = arith.constant 0 : index
    %c0_49 = arith.constant 0 : index
    %73 = vector.load %arg4[%72, %c0_48, %c0_49] : memref<8x8x128xf32, #tpu.memory_space<vmem>>, vector<1x8x128xf32>
    %74 = vector.shape_cast %73 : vector<1x8x128xf32> to vector<8x128xf32>
    %75 = vector.shape_cast %71 : vector<8x128xf32> to vector<1x8x128xf32>
    tpu.vector_store %arg4[%72, %c0_48, %c0_49], %75 {strides = array<i32>} : memref<8x8x128xf32, #tpu.memory_space<vmem>>, vector<1x8x128xf32>,
    %c6_i32 = arith.constant 6 : i32
    %c0_50 = arith.constant 0 : index
    %c0_51 = arith.constant 0 : index
    %76 = vector.load %arg3[%c0_50, %c0_51] : memref<128x128xf32, #tpu.memory_space<vmem>>, vector<128x128xf32>
    %cst_52 = arith.constant dense<0.000000e+00> : vector<8x128xf32>
    %77 = tpu.matmul %71, %76, %cst_52 {dimension_numbers = #tpu.dot_dimension_numbers<[1], [0], [0], [1], [0, 0, 1, 1], [], []>} : vector<8x128xf32>, vector<128x128xf32>, vector<8x128xf32> -> vector<8x128xf32>
    %78 = arith.index_cast %c6_i32 : i32 to index
    %c0_53 = arith.constant 0 : index
    %c0_54 = arith.constant 0 : index
    %79 = vector.load %arg2[%78, %c0_53, %c0_54] : memref<8x8x128xf32, #tpu.memory_space<vmem>>, vector<1x8x128xf32>
    %80 = vector.shape_cast %79 : vector<1x8x128xf32> to vector<8x128xf32>
    %81 = arith.addf %77, %80 : vector<8x128xf32>
    %cst_55 = arith.constant 0.000000e+00 : f32
    %82 = vector.broadcast %cst_55 : f32 to vector<8x128xf32>
    %83 = arith.maximumf %81, %82 : vector<8x128xf32>
    %84 = arith.index_cast %c6_i32 : i32 to index
    %c0_56 = arith.constant 0 : index
    %c0_57 = arith.constant 0 : index
    %85 = vector.load %arg4[%84, %c0_56, %c0_57] : memref<8x8x128xf32, #tpu.memory_space<vmem>>, vector<1x8x128xf32>
    %86 = vector.shape_cast %85 : vector<1x8x128xf32> to vector<8x128xf32>
    %87 = vector.shape_cast %83 : vector<8x128xf32> to vector<1x8x128xf32>
    tpu.vector_store %arg4[%84, %c0_56, %c0_57], %87 {strides = array<i32>} : memref<8x8x128xf32, #tpu.memory_space<vmem>>, vector<1x8x128xf32>,
    %c7_i32 = arith.constant 7 : i32
    %c0_58 = arith.constant 0 : index
    %c0_59 = arith.constant 0 : index
    %88 = vector.load %arg3[%c0_58, %c0_59] : memref<128x128xf32, #tpu.memory_space<vmem>>, vector<128x128xf32>
    %cst_60 = arith.constant dense<0.000000e+00> : vector<8x128xf32>
    %89 = tpu.matmul %83, %88, %cst_60 {dimension_numbers = #tpu.dot_dimension_numbers<[1], [0], [0], [1], [0, 0, 1, 1], [], []>} : vector<8x128xf32>, vector<128x128xf32>, vector<8x128xf32> -> vector<8x128xf32>
    %90 = arith.index_cast %c7_i32 : i32 to index
    %c0_61 = arith.constant 0 : index
    %c0_62 = arith.constant 0 : index
    %91 = vector.load %arg2[%90, %c0_61, %c0_62] : memref<8x8x128xf32, #tpu.memory_space<vmem>>, vector<1x8x128xf32>
    %92 = vector.shape_cast %91 : vector<1x8x128xf32> to vector<8x128xf32>
    %93 = arith.addf %89, %92 : vector<8x128xf32>
    %cst_63 = arith.constant 0.000000e+00 : f32
    %94 = vector.broadcast %cst_63 : f32 to vector<8x128xf32>
    %95 = arith.maximumf %93, %94 : vector<8x128xf32>
    %96 = arith.index_cast %c7_i32 : i32 to index
    %c0_64 = arith.constant 0 : index
    %c0_65 = arith.constant 0 : index
    %97 = vector.load %arg4[%96, %c0_64, %c0_65] : memref<8x8x128xf32, #tpu.memory_space<vmem>>, vector<1x8x128xf32>
    %98 = vector.shape_cast %97 : vector<1x8x128xf32> to vector<8x128xf32>
    %99 = vector.shape_cast %95 : vector<8x128xf32> to vector<1x8x128xf32>
    tpu.vector_store %arg4[%96, %c0_64, %c0_65], %99 {strides = array<i32>} : memref<8x8x128xf32, #tpu.memory_space<vmem>>, vector<1x8x128xf32>,
    %c8_i32 = arith.constant 8 : i32
    %c0_66 = arith.constant 0 : index
    %c0_67 = arith.constant 0 : index
    %100 = vector.load %arg5[%c0_66, %c0_67] : memref<8x128xf32, #tpu.memory_space<vmem>>, vector<8x128xf32>
    tpu.vector_store %arg5[%c0_66, %c0_67], %95 {strides = array<i32>} : memref<8x128xf32, #tpu.memory_space<vmem>>, vector<8x128xf32>,
    return
  }
  func.func @transform_0(%arg0: i32, %arg1: i32) -> (i32, i32, i32) {
    %c0_i32 = arith.constant 0 : i32
    %c0_i32_0 = arith.constant 0 : i32
    return %arg1, %arg0, %c0_i32 : i32, i32, i32
  }
  func.func @transform_1(%arg0: i32, %arg1: i32) -> (i32, i32) {
    %c0_i32 = arith.constant 0 : i32
    %c0_i32_0 = arith.constant 0 : i32
    %c0_i32_1 = arith.constant 0 : i32
    return %c0_i32, %c0_i32_0 : i32, i32
  }
  func.func @transform_2(%arg0: i32, %arg1: i32) -> (i32, i32, i32) {
    %c0_i32 = arith.constant 0 : i32
    %c0_i32_0 = arith.constant 0 : i32
    return %arg1, %arg0, %c0_i32 : i32, i32, i32
  }
}

</mosaic_0001>

<bundles_post_ra>
// kernel: simple_rnn_forward.1
= control target key start
LH: loop header
LB: loop body
LE: loop exit
PB: predicated region body
PF: predicated region fallthrough
CT: control target
= control target key end

     0   :  { %v1373_v0 = vmov 0.0|0.0   ;;  %vm1374_vm0 = vmmov 0   ;;  %v1375_v4 = vmov 0.0   ;;  %s1648_s1 = inlined_call_operand.vmem [shape: f32[128,128], index: 1, kind: input, shape index: {}]   ;;  %s1649_s0 = inlined_call_operand.vmem [shape: f32[8,8,128], index: 0, kind: input, shape index: {}]   ;;  %s1650_s2 = inlined_call_operand.vmem [shape: f32[8,8,128], index: 2, kind: output, shape index: {}]  }
   0x1   :  { %1178 = vmatprep.subr.bf16.mxu0 %v1373_v0  ;;  %v17_v1 = vld [vmem:[%s1648_s1] sm:$0xff]  ;;  %v18_v2 = vld [vmem:[%s1648_s1 + $0x8] sm:$0xff]  ;;  %v19_v3 = vld [vmem:[%s1648_s1 + $0x10] sm:$0xff]  ;;  %930 = vmatprep.mubr.msk.f32.mxu0 %vm1374_vm0, %v1375_v4 }
   0x2   :  { %v1403_v5 = vpack.c.bf16 %v18_v2, %v17_v1  ;;  %v20_v6 = vld [vmem:[%s1648_s1 + $0x18] sm:$0xff]  ;;  %1202 = vmatprep.subr.bf16.mxu1 %v1373_v0  ;;  %965 = vmatprep.mubr.msk.f32.mxu1 %vm1374_vm0, %v1375_v4  ;;  %v21_v8 = vld [vmem:[%s1648_s1 + $0x20] sm:$0xff]  ;;  %v22_v9 = vld [vmem:[%s1648_s1 + $0x28] sm:$0xff] }
   0x3   :  { %v1412_v7 = vpack.c.bf16 %v20_v6, %v19_v3  ;;  %v1424_v10 = vpack.c.bf16 %v22_v9, %v21_v8  ;;  %v23_v11 = vld [vmem:[%s1648_s1 + $0x30] sm:$0xff]  ;;  %v24_v12 = vld [vmem:[%s1648_s1 + $0x38] sm:$0xff]  ;;  %v25_v14 = vld [vmem:[%s1648_s1 + $0x40] sm:$0xff] }
   0x4   :  { %1180 = vmatpush3.bf16.msra.mxu0 %v1403_v5  ;;  %1204 = vmatpush3.bf16.msra.mxu1 %v1403_v5  ;;  %v1436_v13 = vpack.c.bf16 %v24_v12, %v23_v11  ;;  %v26_v15 = vld [vmem:[%s1648_s1 + $0x48] sm:$0xff]  ;;  %v27_v17 = vld [vmem:[%s1648_s1 + $0x50] sm:$0xff]  ;;  %v28_v18 = vld [vmem:[%s1648_s1 + $0x58] sm:$0xff] }
   0x5   :  { %1181 = vmatprep.subr.bf16.mxu0 %v1373_v0  ;;  %1205 = vmatprep.subr.bf16.mxu1 %v1373_v0  ;;  %v1448_v16 = vpack.c.bf16 %v26_v15, %v25_v14  ;;  %v1460_v19 = vpack.c.bf16 %v28_v18, %v27_v17  ;;  %v29_v20 = vld [vmem:[%s1648_s1 + $0x60] sm:$0xff]  ;;  %v30_v21 = vld [vmem:[%s1648_s1 + $0x68] sm:$0xff]  ;;  %v31_v23 = vld [vmem:[%s1648_s1 + $0x70] sm:$0xff] }
   0x6   :  { %v1472_v22 = vpack.c.bf16 %v30_v21, %v29_v20  ;;  %v32_v24 = vld [vmem:[%s1648_s1 + $0x78] sm:$0xff]  ;;  %v33_v26 = vld [vmem:[%s1649_s0] sm:$0xff]  ;;  %v748_v31 = vld [vmem:[%s1649_s0 + $0x8] sm:$0xff] }
   0x7   :  { %v1484_v25 = vpack.c.bf16 %v32_v24, %v31_v23  ;;  %v750_v36 = vld [vmem:[%s1649_s0 + $0x10] sm:$0xff]  ;;  %v752_v41 = vld [vmem:[%s1649_s0 + $0x18] sm:$0xff]  ;;  %v754_v46 = vld [vmem:[%s1649_s0 + $0x20] sm:$0xff] }
   0x8   :  { %1183 = vmatpush3.bf16.msra.mxu0 %v1412_v7  ;;  %1207 = vmatpush3.bf16.msra.mxu1 %v1412_v7  ;;  %v756_v51 = vld [vmem:[%s1649_s0 + $0x28] sm:$0xff]  ;;  %v758_v56 = vld [vmem:[%s1649_s0 + $0x30] sm:$0xff]  ;;  %v760_v61 = vld [vmem:[%s1649_s0 + $0x38] sm:$0xff] }
   0x9   :  { %1184 = vmatprep.subr.bf16.mxu0 %v1373_v0  ;;  %1208 = vmatprep.subr.bf16.mxu1 %v1373_v0 }
   0xc   :  { %1186 = vmatpush3.bf16.msra.mxu0 %v1424_v10  ;;  %1210 = vmatpush3.bf16.msra.mxu1 %v1424_v10 }
   0xd   :  { %1187 = vmatprep.subr.bf16.mxu0 %v1373_v0  ;;  %1211 = vmatprep.subr.bf16.mxu1 %v1373_v0 }
  0x10   :  { %1189 = vmatpush3.bf16.msra.mxu0 %v1436_v13  ;;  %1213 = vmatpush3.bf16.msra.mxu1 %v1436_v13 }
  0x11   :  { %1190 = vmatprep.subr.bf16.mxu0 %v1373_v0  ;;  %1214 = vmatprep.subr.bf16.mxu1 %v1373_v0 }
  0x14   :  { %1192 = vmatpush3.bf16.msra.mxu0 %v1448_v16  ;;  %1216 = vmatpush3.bf16.msra.mxu1 %v1448_v16 }
  0x15   :  { %1193 = vmatprep.subr.bf16.mxu0 %v1373_v0  ;;  %1217 = vmatprep.subr.bf16.mxu1 %v1373_v0 }
  0x18   :  { %1195 = vmatpush3.bf16.msra.mxu0 %v1460_v19  ;;  %1219 = vmatpush3.bf16.msra.mxu1 %v1460_v19 }
  0x19   :  { %1196 = vmatprep.subr.bf16.mxu0 %v1373_v0  ;;  %1220 = vmatprep.subr.bf16.mxu1 %v1373_v0 }
  0x1c   :  { %1198 = vmatpush3.bf16.msra.mxu0 %v1472_v22  ;;  %1222 = vmatpush3.bf16.msra.mxu1 %v1472_v22 }
  0x1d   :  { %1199 = vmatprep.subr.bf16.mxu0 %v1373_v0  ;;  %1223 = vmatprep.subr.bf16.mxu1 %v1373_v0 }
  0x20   :  { %1201 = vmatpush3.bf16.msra.mxu0 %v1484_v25  ;;  %1225 = vmatpush3.bf16.msra.mxu1 %v1484_v25 }
  0x21   :  { %1226 = vmatprep.subr.bf16.mxu0 %v1373_v0  ;;  %1250 = vmatprep.subr.bf16.mxu1 %v1373_v0 }
  0x23   :  { %931 = vmatmul.mubr.f32.vlgmr.msra.gmra.mrb[0].mxu0 %v1375_v4 }
  0x24   :  { %1228 = vmatpush3.bf16.msra.mxu0 %v1403_v5  ;;  %1000 = vmatprep.mubr.msk.f32.mxu0 %vm1374_vm0, %v1375_v4 }
  0x25   :  { %1229 = vmatprep.subr.bf16.mxu0 %v1373_v0 }
  0x28   :  { %1231 = vmatpush3.bf16.msra.mxu0 %v1412_v7 }
  0x29   :  { %1232 = vmatprep.subr.bf16.mxu0 %v1373_v0 }
  0x2c   :  { %1234 = vmatpush3.bf16.msra.mxu0 %v1424_v10 }
  0x2d   :  { %1235 = vmatprep.subr.bf16.mxu0 %v1373_v0 }
  0x30   :  { %1237 = vmatpush3.bf16.msra.mxu0 %v1436_v13 }
  0x31   :  { %1238 = vmatprep.subr.bf16.mxu0 %v1373_v0 }
  0x34   :  { %1240 = vmatpush3.bf16.msra.mxu0 %v1448_v16 }
  0x35   :  { %1241 = vmatprep.subr.bf16.mxu0 %v1373_v0 }
  0x38   :  { %1243 = vmatpush3.bf16.msra.mxu0 %v1460_v19 }
  0x39   :  { %1244 = vmatprep.subr.bf16.mxu0 %v1373_v0 }
  0x3c   :  { %1246 = vmatpush3.bf16.msra.mxu0 %v1472_v22 }
  0x3d   :  { %1247 = vmatprep.subr.bf16.mxu0 %v1373_v0 }
  0x40   :  { %1249 = vmatpush3.bf16.msra.mxu0 %v1484_v25 }
  0x41   :  { %1274 = vmatprep.subr.bf16.mxu0 %v1373_v0 }
  0xf6   :  { %v100_v27 = vpop.f32.mrb[0].mxu0 }
  0xf7   :  { %v101_v28 = vadd.f32 %v100_v27, %v33_v26  ;;  %v932_v29 = vpop.f32.mrb[1].mxu0 }
  0xf9   :  { %v104_v30 = vmax.f32 %v101_v28, 0.0 }
  0xfb   :  { %105 = vst [vmem:[%s1650_s2] sm:$0xff] %v104_v30  ;;  %966 = vmatmul.mubr.f32.vlgmr.msra.gmra.mrb[0].mxu1 %v104_v30 }
  0xfc   :  { %1252 = vmatpush3.bf16.msra.mxu1 %v1403_v5  ;;  %1035 = vmatprep.mubr.msk.f32.mxu1 %vm1374_vm0, %v1375_v4 }
  0xfd   :  { %1253 = vmatprep.subr.bf16.mxu1 %v1373_v0 }
 0x100   :  { %1255 = vmatpush3.bf16.msra.mxu1 %v1412_v7 }
 0x101   :  { %1256 = vmatprep.subr.bf16.mxu1 %v1373_v0 }
 0x104   :  { %1258 = vmatpush3.bf16.msra.mxu1 %v1424_v10 }
 0x105   :  { %1259 = vmatprep.subr.bf16.mxu1 %v1373_v0 }
 0x108   :  { %1261 = vmatpush3.bf16.msra.mxu1 %v1436_v13 }
 0x109   :  { %1262 = vmatprep.subr.bf16.mxu1 %v1373_v0 }
 0x10c   :  { %1264 = vmatpush3.bf16.msra.mxu1 %v1448_v16 }
 0x10d   :  { %1265 = vmatprep.subr.bf16.mxu1 %v1373_v0 }
 0x110   :  { %1267 = vmatpush3.bf16.msra.mxu1 %v1460_v19 }
 0x111   :  { %1268 = vmatprep.subr.bf16.mxu1 %v1373_v0 }
 0x114   :  { %1270 = vmatpush3.bf16.msra.mxu1 %v1472_v22 }
 0x115   :  { %1271 = vmatprep.subr.bf16.mxu1 %v1373_v0 }
 0x118   :  { %1273 = vmatpush3.bf16.msra.mxu1 %v1484_v25 }
 0x119   :  { %1298 = vmatprep.subr.bf16.mxu1 %v1373_v0 }
 0x1ce   :  { %v190_v32 = vpop.f32.mrb[0].mxu1 }
 0x1cf   :  { %v191_v33 = vadd.f32 %v748_v31, %v190_v32  ;;  %v967_v34 = vpop.f32.mrb[1].mxu1 }
 0x1d1   :  { %v194_v35 = vmax.f32 %v191_v33, 0.0 }
 0x1d3   :  { %749 = vst [vmem:[%s1650_s2 + $0x8] sm:$0xff] %v194_v35  ;;  %1001 = vmatmul.mubr.f32.vlgmr.msra.gmra.mrb[2].mxu0 %v194_v35 }
 0x1d4   :  { %1276 = vmatpush3.bf16.msra.mxu0 %v1403_v5  ;;  %1070 = vmatprep.mubr.msk.f32.mxu0 %vm1374_vm0, %v1375_v4 }
 0x1d5   :  { %1277 = vmatprep.subr.bf16.mxu0 %v1373_v0 }
 0x1d8   :  { %1279 = vmatpush3.bf16.msra.mxu0 %v1412_v7 }
 0x1d9   :  { %1280 = vmatprep.subr.bf16.mxu0 %v1373_v0 }
 0x1dc   :  { %1282 = vmatpush3.bf16.msra.mxu0 %v1424_v10 }
 0x1dd   :  { %1283 = vmatprep.subr.bf16.mxu0 %v1373_v0 }
 0x1e0   :  { %1285 = vmatpush3.bf16.msra.mxu0 %v1436_v13 }
 0x1e1   :  { %1286 = vmatprep.subr.bf16.mxu0 %v1373_v0 }
 0x1e4   :  { %1288 = vmatpush3.bf16.msra.mxu0 %v1448_v16 }
 0x1e5   :  { %1289 = vmatprep.subr.bf16.mxu0 %v1373_v0 }
 0x1e8   :  { %1291 = vmatpush3.bf16.msra.mxu0 %v1460_v19 }
 0x1e9   :  { %1292 = vmatprep.subr.bf16.mxu0 %v1373_v0 }
 0x1ec   :  { %1294 = vmatpush3.bf16.msra.mxu0 %v1472_v22 }
 0x1ed   :  { %1295 = vmatprep.subr.bf16.mxu0 %v1373_v0 }
 0x1f0   :  { %1297 = vmatpush3.bf16.msra.mxu0 %v1484_v25 }
 0x1f1   :  { %1322 = vmatprep.subr.bf16.mxu0 %v1373_v0 }
 0x2a6   :  { %v281_v37 = vpop.f32.mrb[2].mxu0 }
 0x2a7   :  { %v282_v38 = vadd.f32 %v750_v36, %v281_v37  ;;  %v1002_v39 = vpop.f32.mrb[3].mxu0 }
 0x2a9   :  { %v285_v40 = vmax.f32 %v282_v38, 0.0 }
 0x2ab   :  { %751 = vst [vmem:[%s1650_s2 + $0x10] sm:$0xff] %v285_v40  ;;  %1036 = vmatmul.mubr.f32.vlgmr.msra.gmra.mrb[2].mxu1 %v285_v40 }
 0x2ac   :  { %1300 = vmatpush3.bf16.msra.mxu1 %v1403_v5  ;;  %1105 = vmatprep.mubr.msk.f32.mxu1 %vm1374_vm0, %v1375_v4 }
 0x2ad   :  { %1301 = vmatprep.subr.bf16.mxu1 %v1373_v0 }
 0x2b0   :  { %1303 = vmatpush3.bf16.msra.mxu1 %v1412_v7 }
 0x2b1   :  { %1304 = vmatprep.subr.bf16.mxu1 %v1373_v0 }
 0x2b4   :  { %1306 = vmatpush3.bf16.msra.mxu1 %v1424_v10 }
 0x2b5   :  { %1307 = vmatprep.subr.bf16.mxu1 %v1373_v0 }
 0x2b8   :  { %1309 = vmatpush3.bf16.msra.mxu1 %v1436_v13 }
 0x2b9   :  { %1310 = vmatprep.subr.bf16.mxu1 %v1373_v0 }
 0x2bc   :  { %1312 = vmatpush3.bf16.msra.mxu1 %v1448_v16 }
 0x2bd   :  { %1313 = vmatprep.subr.bf16.mxu1 %v1373_v0 }
 0x2c0   :  { %1315 = vmatpush3.bf16.msra.mxu1 %v1460_v19 }
 0x2c1   :  { %1316 = vmatprep.subr.bf16.mxu1 %v1373_v0 }
 0x2c4   :  { %1318 = vmatpush3.bf16.msra.mxu1 %v1472_v22 }
 0x2c5   :  { %1319 = vmatprep.subr.bf16.mxu1 %v1373_v0 }
 0x2c8   :  { %1321 = vmatpush3.bf16.msra.mxu1 %v1484_v25 }
 0x2c9   :  { %1346 = vmatprep.subr.bf16.mxu1 %v1373_v0 }
 0x37e   :  { %v372_v42 = vpop.f32.mrb[2].mxu1 }
 0x37f   :  { %v373_v43 = vadd.f32 %v752_v41, %v372_v42  ;;  %v1037_v44 = vpop.f32.mrb[3].mxu1 }
 0x381   :  { %v376_v45 = vmax.f32 %v373_v43, 0.0 }
 0x383   :  { %753 = vst [vmem:[%s1650_s2 + $0x18] sm:$0xff] %v376_v45  ;;  %1071 = vmatmul.mubr.f32.vlgmr.msra.gmra.mrb[4].mxu0 %v376_v45 }
 0x384   :  { %1324 = vmatpush3.bf16.msra.mxu0 %v1403_v5  ;;  %1140 = vmatprep.mubr.msk.f32.mxu0 %vm1374_vm0, %v1375_v4 }
 0x385   :  { %1325 = vmatprep.subr.bf16.mxu0 %v1373_v0 }
 0x388   :  { %1327 = vmatpush3.bf16.msra.mxu0 %v1412_v7 }
 0x389   :  { %1328 = vmatprep.subr.bf16.mxu0 %v1373_v0 }
 0x38c   :  { %1330 = vmatpush3.bf16.msra.mxu0 %v1424_v10 }
 0x38d   :  { %1331 = vmatprep.subr.bf16.mxu0 %v1373_v0 }
 0x390   :  { %1333 = vmatpush3.bf16.msra.mxu0 %v1436_v13 }
 0x391   :  { %1334 = vmatprep.subr.bf16.mxu0 %v1373_v0 }
 0x394   :  { %1336 = vmatpush3.bf16.msra.mxu0 %v1448_v16 }
 0x395   :  { %1337 = vmatprep.subr.bf16.mxu0 %v1373_v0 }
 0x398   :  { %1339 = vmatpush3.bf16.msra.mxu0 %v1460_v19 }
 0x399   :  { %1340 = vmatprep.subr.bf16.mxu0 %v1373_v0 }
 0x39c   :  { %1342 = vmatpush3.bf16.msra.mxu0 %v1472_v22 }
 0x39d   :  { %1343 = vmatprep.subr.bf16.mxu0 %v1373_v0 }
 0x3a0   :  { %1345 = vmatpush3.bf16.msra.mxu0 %v1484_v25 }
 0x456   :  { %v463_v47 = vpop.f32.mrb[4].mxu0 }
 0x457   :  { %v464_v48 = vadd.f32 %v754_v46, %v463_v47  ;;  %v1072_v49 = vpop.f32.mrb[5].mxu0 }
 0x459   :  { %v467_v50 = vmax.f32 %v464_v48, 0.0 }
 0x45b   :  { %755 = vst [vmem:[%s1650_s2 + $0x20] sm:$0xff] %v467_v50  ;;  %1106 = vmatmul.mubr.f32.vlgmr.msra.gmra.mrb[4].mxu1 %v467_v50 }
 0x45c   :  { %1348 = vmatpush3.bf16.msra.mxu1 %v1403_v5  ;;  %1175 = vmatprep.mubr.msk.f32.mxu1 %vm1374_vm0, %v1375_v4 }
 0x45d   :  { %1349 = vmatprep.subr.bf16.mxu1 %v1373_v0 }
 0x460   :  { %1351 = vmatpush3.bf16.msra.mxu1 %v1412_v7 }
 0x461   :  { %1352 = vmatprep.subr.bf16.mxu1 %v1373_v0 }
 0x464   :  { %1354 = vmatpush3.bf16.msra.mxu1 %v1424_v10 }
 0x465   :  { %1355 = vmatprep.subr.bf16.mxu1 %v1373_v0 }
 0x468   :  { %1357 = vmatpush3.bf16.msra.mxu1 %v1436_v13 }
 0x469   :  { %1358 = vmatprep.subr.bf16.mxu1 %v1373_v0 }
 0x46c   :  { %1360 = vmatpush3.bf16.msra.mxu1 %v1448_v16 }
 0x46d   :  { %1361 = vmatprep.subr.bf16.mxu1 %v1373_v0 }
 0x470   :  { %1363 = vmatpush3.bf16.msra.mxu1 %v1460_v19 }
 0x471   :  { %1364 = vmatprep.subr.bf16.mxu1 %v1373_v0 }
 0x474   :  { %1366 = vmatpush3.bf16.msra.mxu1 %v1472_v22 }
 0x475   :  { %1367 = vmatprep.subr.bf16.mxu1 %v1373_v0 }
 0x478   :  { %1369 = vmatpush3.bf16.msra.mxu1 %v1484_v25 }
 0x52e   :  { %v554_v52 = vpop.f32.mrb[4].mxu1 }
 0x52f   :  { %v555_v53 = vadd.f32 %v756_v51, %v554_v52  ;;  %v1107_v54 = vpop.f32.mrb[5].mxu1 }
 0x531   :  { %v558_v55 = vmax.f32 %v555_v53, 0.0 }
 0x533   :  { %757 = vst [vmem:[%s1650_s2 + $0x28] sm:$0xff] %v558_v55  ;;  %1141 = vmatmul.mubr.f32.vlgmr.msra.gmra.mrb[6].mxu0 %v558_v55 }
 0x606   :  { %v645_v57 = vpop.f32.mrb[6].mxu0 }
 0x607   :  { %v646_v58 = vadd.f32 %v758_v56, %v645_v57  ;;  %v1142_v59 = vpop.f32.mrb[7].mxu0 }
 0x609   :  { %v649_v60 = vmax.f32 %v646_v58, 0.0 }
 0x60b   :  { %759 = vst [vmem:[%s1650_s2 + $0x30] sm:$0xff] %v649_v60  ;;  %1176 = vmatmul.mubr.f32.vlgmr.msra.gmra.mrb[6].mxu1 %v649_v60 }
 0x6de   :  { %v736_v62 = vpop.f32.mrb[6].mxu1 }
 0x6df   :  { %v737_v63 = vadd.f32 %v760_v61, %v736_v62  ;;  %v1177_v0 = vpop.f32.mrb[7].mxu1 }
 0x6e1   :  { %v740_v1 = vmax.f32 %v737_v63, 0.0 }
 0x6e3   :  { %761 = vst [vmem:[%s1650_s2 + $0x38] sm:$0xff] %v740_v1 }

</bundles_post_ra>
